<compile_context>
chip_gen: v5e
topology: v5e:2x2
jax: 0.10.0
libtpu: 0.0.40
codegen_flags: <defaults>
</compile_context>

<pallas_src>
import functools

import jax
import jax.numpy as jnp
from jax.experimental import pallas as pl
from jax.experimental.pallas import tpu as pltpu

EPS = 1e-07  # matches the PyTorch module file


def _round_up(a, b):
    return (a + b - 1) // b * b


def _block_diag3(w):
    """[O, I] -> [3O, 3I]: `w` repeated on the diagonal, one block per 3-vector component."""
    o, i = w.shape
    out = jnp.zeros((3 * o, 3 * i), w.dtype)
    for d in range(3):
        out = out.at[d * o:(d + 1) * o, d * i:(d + 1) * i].set(w)
    return out


def pack_vnstd_weights(w1_feat, w1_dir, w2_feat, w2_dir, w_lin):
    """Pack PyTorch nn.Linear weights ([C_out, C_in]) into fused per-layer matrices.

    Layer k: [6*C_out, 3*C_in] = [blockdiag3(w_feat); blockdiag3(w_dir)]
    vn_lin : [9, 3*C4]         = blockdiag3(w_lin)
    """
    w1 = jnp.concatenate([_block_diag3(w1_feat), _block_diag3(w1_dir)], axis=0)
    w2 = jnp.concatenate([_block_diag3(w2_feat), _block_diag3(w2_dir)], axis=0)
    wl = _block_diag3(w_lin)
    return w1, w2, wl


def _vnstd_kernel(x_ref, w1_ref, w2_ref, wl_ref, xstd_ref, z0_ref, *,
                  c_in, negative_slope, eps):
    c2 = c_in // 2
    c4 = c_in // 4
    ns = negative_slope

    x = x_ref[...]                                   # (3*C_in, tn), row = d*C_in + channel

    def vn_layer(inp, w, c_out):
        # ONE fused MXU matmul per layer; result rows are
        #   [feat(d=0..2, c=0..c_out-1) ; dir(d=0..2, c=0..c_out-1)]
        r = jnp.dot(w, inp, preferred_element_type=jnp.float32)      # (6*c_out, tn)
        p = r[:3 * c_out, :]                                         # (3*c_out, tn)
        d = r[3 * c_out:, :]
        pd = p * d
        dd = d * d
        # 3-vector reductions = tile-aligned sublane views + VPU adds (no cross-lane work).
        dot = pd[:c_out] + pd[c_out:2 * c_out] + pd[2 * c_out:]      # (c_out, tn)
        dns = dd[:c_out] + dd[c_out:2 * c_out] + dd[2 * c_out:] + eps
        inv = pl.reciprocal(dns, approx=True)                        # EUP slot (off the VALU)
        inv = inv * (2.0 - dns * inv)                                # one Newton step -> ~f32 accuracy
        q = dot * inv
        dot3 = jnp.concatenate([dot, dot, dot], axis=0)              # broadcast over components
        q3 = jnp.concatenate([q, q, q], axis=0)
        out = ns * p + (1.0 - ns) * jnp.where(dot3 >= 0.0, p, p - q3 * d)
        return out                                                   # (3*c_out, tn)

    z1 = vn_layer(x, w1_ref[...], c2)                # (3*C2, tn)
    z2 = vn_layer(z1, w2_ref[...], c4)               # (3*C4, tn)

    # vn_lin (fused over components): z0[d*3 + k, n] = sum_c w_lin[k, c] * z2[d*C4 + c, n]
    z0 = jnp.dot(wl_ref[...], z2, preferred_element_type=jnp.float32)    # (9, tn)
    z0_ref[...] = z0.astype(z0_ref.dtype)

    # x_std[k*C_in + i, n] = sum_d x[d*C_in + i, n] * z0[d*3 + k, n]
    xs = [x[d * c_in:(d + 1) * c_in, :] for d in range(3)]
    rows = []
    for k in range(3):
        acc = xs[0] * z0[k:k + 1, :]
        acc = acc + xs[1] * z0[3 + k:4 + k, :]
        acc = acc + xs[2] * z0[6 + k:7 + k, :]
        rows.append(acc)
    xstd_ref[...] = jnp.concatenate(rows, axis=0).astype(xstd_ref.dtype)


def vn_std_feature_slab(x_slab, w1_packed, w2_packed, wl_packed, *,
                        c_in, negative_slope=0.2, tile_n=4096):
    """Fused VNStdFeature forward on slab-layout data (the performance entry point).

    x_slab : [3*C_in, N] f32, row = component*C_in + channel, lanes = samples.
    Returns:
      x_std_slab [3*C_in, N] with row = frame_axis*C_in + channel
      z0_slab    [9, N]      with row = component*3 + frame_axis
    """
    three_c, n = x_slab.shape
    assert three_c == 3 * c_in
    c2, c4 = c_in // 2, c_in // 4
    # Fused sublane views require C_in//4 to be a multiple of 8.
    assert c_in % 32 == 0, "fused VNStdFeature kernel requires in_channels % 32 == 0"
    assert w1_packed.shape == (6 * c2, 3 * c_in)
    assert w2_packed.shape == (6 * c4, 3 * c2)
    assert wl_packed.shape == (9, 3 * c4)

    # Sample tile: multiple of 128 lanes so every store is lane-dense.
    tn = _round_up(min(tile_n, _round_up(n, 128)), 128)
    n_pad = _round_up(n, tn)
    if n_pad != n:
        # Explicit zero-pad (zeros are inert through the whole formula).  Never rely on
        # out-of-bounds last blocks: stale VMEM could poison the divide.
        x_slab = jnp.pad(x_slab, ((0, 0), (0, n_pad - n)))

    grid = (n_pad // tn,)

    kernel = functools.partial(_vnstd_kernel, c_in=c_in,
                               negative_slope=float(negative_slope), eps=EPS)

    mxu_flops = 2 * n_pad * (6 * c2 * 3 * c_in + 6 * c4 * 3 * c2 + 9 * 3 * c4)
    vpu_flops = n_pad * (12 * 3 * c2 + 12 * 3 * c4 + 18 * c_in)
    bytes_accessed = 4 * (n_pad * (2 * 3 * c_in + 9)
                          + 6 * c2 * 3 * c_in + 6 * c4 * 3 * c2 + 9 * 3 * c4)

    # Scoped-VMEM budget: double-buffered x / x_std tiles + in-flight intermediates.
    # v5e default is only 16 MiB; keep well under v7x's 64 MiB/TC.
    per_lane_bytes = 4 * (8 * 3 * c_in + 64)
    vmem_limit = int(min(48 * 1024 * 1024,
                         max(32 * 1024 * 1024, per_lane_bytes * tn + (2 << 20))))

    xstd_slab, z0_slab = pl.pallas_call(
        kernel,
        out_shape=(
            jax.ShapeDtypeStruct((3 * c_in, n_pad), x_slab.dtype),   # x_std slab
            jax.ShapeDtypeStruct((9, n_pad), x_slab.dtype),          # z0 packed sublane-dense
        ),
        grid=grid,
        in_specs=[
            pl.BlockSpec((3 * c_in, tn), lambda i: (0, i)),          # x sample tile
            pl.BlockSpec((6 * c2, 3 * c_in), lambda i: (0, 0)),      # weights stay resident
            pl.BlockSpec((6 * c4, 3 * c2), lambda i: (0, 0)),
            pl.BlockSpec((9, 3 * c4), lambda i: (0, 0)),
        ],
        out_specs=(
            pl.BlockSpec((3 * c_in, tn), lambda i: (0, i)),
            pl.BlockSpec((9, tn), lambda i: (0, i)),
        ),
        compiler_params=pltpu.CompilerParams(
            dimension_semantics=("parallel",),                       # independent sample tiles
            vmem_limit_bytes=vmem_limit,
        ),
        cost_estimate=pl.CostEstimate(
            flops=int(mxu_flops + vpu_flops),
            transcendentals=int(n_pad * (c2 + c4)),
            bytes_accessed=int(bytes_accessed),
        ),
    )(x_slab, w1_packed, w2_packed, wl_packed)

    if n_pad != n:
        xstd_slab = xstd_slab[:, :n]
        z0_slab = z0_slab[:, :n]
    return xstd_slab, z0_slab


def vn_std_feature(x, w1_feat, w1_dir, w2_feat, w2_dir, w_lin, *,
                   negative_slope=0.2, tile_n=4096):
    """PyTorch-layout compatibility wrapper (layout glue at the module boundary only).

    x: [N, C_in, 3] f32; weights in nn.Linear layout [C_out, C_in].
    Returns (x_std [N, C_in, 3], z0 [N, 3, 3]) matching VNStdFeature.forward with
    normalize_frame=False, share_nonlinearity=False, ubn=False.
    In a full VN pipeline, call `vn_std_feature_slab` directly to avoid these transposes.
    """
    n, c_in, d3 = x.shape
    assert d3 == 3
    w1p, w2p, wlp = pack_vnstd_weights(w1_feat, w1_dir, w2_feat, w2_dir, w_lin)
    x_slab = jnp.transpose(x, (2, 1, 0)).reshape(3 * c_in, n)
    xstd_slab, z0_slab = vn_std_feature_slab(
        x_slab, w1p, w2p, wlp, c_in=c_in,
        negative_slope=negative_slope, tile_n=tile_n)
    x_std = jnp.transpose(xstd_slab.reshape(3, c_in, n), (2, 1, 0))   # [N, C_in, 3]
    z0 = jnp.transpose(z0_slab, (1, 0)).reshape(n, 3, 3)              # [N, 3, 3]
    return x_std, z0


def _reference(x, w1_feat, w1_dir, w2_feat, w2_dir, w_lin, negative_slope):
    """Plain-JAX transcription of the PyTorch forward (default config)."""
    hp = jax.lax.Precision.HIGHEST

    def vn_linear(x, w):
        return jnp.einsum('oc,ncd->nod', w, x, precision=hp)

    def vn_leaky(x, wf, wd):
        p = vn_linear(x, wf)
        d = vn_linear(x, wd)
        dot = jnp.sum(p * d, axis=2, keepdims=True)
        mask = (dot >= 0).astype(x.dtype)
        dns = jnp.sum(d * d, axis=2, keepdims=True)
        ns = negative_slope
        return ns * p + (1 - ns) * (mask * p + (1 - mask) * (p - dot / (dns + EPS) * d))

    z = vn_leaky(x, w1_feat, w1_dir)
    z = vn_leaky(z, w2_feat, w2_dir)
    z0 = vn_linear(z, w_lin)                          # [N, 3, 3]
    z0 = jnp.transpose(z0, (0, 2, 1))                 # .transpose(1, 2)
    x_std = jnp.einsum('nij,njk->nik', x, z0, precision=hp)
    return x_std, z0


if __name__ == "__main__":
    # Small shapes consistent with the module: N_samples=16, in_channels=32.
    N, C_in = 16, 32
    negative_slope = 0.2
    C2, C4 = C_in // 2, C_in // 4

    key = jax.random.PRNGKey(0)
    kx, k1, k2, k3, k4, k5 = jax.random.split(key, 6)

    x = jax.random.normal(kx, (N, C_in, 3), dtype=jnp.float32)

    def init_w(k, out_c, in_c):
        bound = 1.0 / (in_c ** 0.5)
        return jax.random.uniform(k, (out_c, in_c), dtype=jnp.float32,
                                  minval=-bound, maxval=bound)

    w1_feat = init_w(k1, C2, C_in)
    w1_dir = init_w(k2, C2, C_in)
    w2_feat = init_w(k3, C4, C2)
    w2_dir = init_w(k4, C4, C2)
    w_lin = init_w(k5, 3, C4)

    x_std, z0 = vn_std_feature(x, w1_feat, w1_dir, w2_feat, w2_dir, w_lin,
                               negative_slope=negative_slope)
    x_std, z0 = jax.block_until_ready((x_std, z0))

    ref_std, ref_z0 = _reference(x, w1_feat, w1_dir, w2_feat, w2_dir, w_lin,
                                 negative_slope)

    assert x_std.shape == (N, C_in, 3)
    assert z0.shape == (N, 3, 3)
    assert jnp.allclose(x_std, ref_std, atol=2e-4, rtol=2e-4)
    assert jnp.allclose(z0, ref_z0, atol=2e-4, rtol=2e-4)

    print("KERNEL_OK")
</pallas_src>

<mosaic_0001>
module attributes {stable_mosaic.version = 11 : i64} {
  func.func @_vnstd_kernel(%arg0: i32, %arg1: memref<96x128xf32, #tpu.memory_space<vmem>>, %arg2: memref<96x96xf32, #tpu.memory_space<vmem>>, %arg3: memref<48x48xf32, #tpu.memory_space<vmem>>, %arg4: memref<9x24xf32, #tpu.memory_space<vmem>>, %arg5: memref<96x128xf32, #tpu.memory_space<vmem>>, %arg6: memref<9x128xf32, #tpu.memory_space<vmem>>) attributes {dimension_semantics = [#tpu.dimension_semantics<parallel>], iteration_bounds = array<i64: 1>, scalar_prefetch = 0 : i64, scratch_operands = 0 : i64, tpu.core_type = #tpu.core_type<tc>, window_params = [{transform_indices = @transform_0, window_bounds = array<i64: 96, 128>}, {pipeline_mode = #tpu.pipeline_mode<synchronous>, transform_indices = @transform_1, window_bounds = array<i64: 96, 96>}, {pipeline_mode = #tpu.pipeline_mode<synchronous>, transform_indices = @transform_2, window_bounds = array<i64: 48, 48>}, {pipeline_mode = #tpu.pipeline_mode<synchronous>, transform_indices = @transform_3, window_bounds = array<i64: 9, 24>}, {transform_indices = @transform_4, window_bounds = array<i64: 96, 128>}, {transform_indices = @transform_5, window_bounds = array<i64: 9, 128>}]} {
    %c0 = arith.constant 0 : index
    %c0_0 = arith.constant 0 : index
    %0 = vector.load %arg1[%c0, %c0_0] : memref<96x128xf32, #tpu.memory_space<vmem>>, vector<96x128xf32>
    %c0_1 = arith.constant 0 : index
    %c0_2 = arith.constant 0 : index
    %1 = vector.load %arg2[%c0_1, %c0_2] : memref<96x96xf32, #tpu.memory_space<vmem>>, vector<96x96xf32>
    %cst = arith.constant dense<0.000000e+00> : vector<96x128xf32>
    %2 = tpu.matmul %1, %0, %cst {dimension_numbers = #tpu.dot_dimension_numbers<[1], [0], [0], [1], [0, 0, 1, 1], [], []>} : vector<96x96xf32>, vector<96x128xf32>, vector<96x128xf32> -> vector<96x128xf32>
    %3 = vector.extract_strided_slice %2 {offsets = [0, 0], sizes = [48, 128], strides = [1, 1]} : vector<96x128xf32> to vector<48x128xf32>
    %4 = vector.extract_strided_slice %2 {offsets = [48, 0], sizes = [48, 128], strides = [1, 1]} : vector<96x128xf32> to vector<48x128xf32>
    %5 = arith.mulf %3, %4 : vector<48x128xf32>
    %6 = arith.mulf %4, %4 : vector<48x128xf32>
    %7 = vector.extract_strided_slice %5 {offsets = [0, 0], sizes = [16, 128], strides = [1, 1]} : vector<48x128xf32> to vector<16x128xf32>
    %8 = vector.extract_strided_slice %5 {offsets = [16, 0], sizes = [16, 128], strides = [1, 1]} : vector<48x128xf32> to vector<16x128xf32>
    %9 = arith.addf %7, %8 : vector<16x128xf32>
    %10 = vector.extract_strided_slice %5 {offsets = [32, 0], sizes = [16, 128], strides = [1, 1]} : vector<48x128xf32> to vector<16x128xf32>
    %11 = arith.addf %9, %10 : vector<16x128xf32>
    %12 = vector.extract_strided_slice %6 {offsets = [0, 0], sizes = [16, 128], strides = [1, 1]} : vector<48x128xf32> to vector<16x128xf32>
    %13 = vector.extract_strided_slice %6 {offsets = [16, 0], sizes = [16, 128], strides = [1, 1]} : vector<48x128xf32> to vector<16x128xf32>
    %14 = arith.addf %12, %13 : vector<16x128xf32>
    %15 = vector.extract_strided_slice %6 {offsets = [32, 0], sizes = [16, 128], strides = [1, 1]} : vector<48x128xf32> to vector<16x128xf32>
    %16 = arith.addf %14, %15 : vector<16x128xf32>
    %cst_3 = arith.constant 1.000000e-07 : f32
    %17 = vector.broadcast %cst_3 : f32 to vector<16x128xf32>
    %18 = arith.addf %16, %17 : vector<16x128xf32>
    %19 = tpu.reciprocal %18 {approx = true} : vector<16x128xf32> -> vector<16x128xf32>
    %20 = arith.mulf %18, %19 : vector<16x128xf32>
    %cst_4 = arith.constant 2.000000e+00 : f32
    %21 = vector.broadcast %cst_4 : f32 to vector<16x128xf32>
    %22 = arith.subf %21, %20 : vector<16x128xf32>
    %23 = arith.mulf %19, %22 : vector<16x128xf32>
    %24 = arith.mulf %11, %23 : vector<16x128xf32>
    %25 = tpu.concatenate %11, %11, %11 in 0 : vector<16x128xf32>, vector<16x128xf32>, vector<16x128xf32> -> vector<48x128xf32>
    %26 = tpu.concatenate %24, %24, %24 in 0 : vector<16x128xf32>, vector<16x128xf32>, vector<16x128xf32> -> vector<48x128xf32>
    %cst_5 = arith.constant 2.000000e-01 : f32
    %27 = vector.broadcast %cst_5 : f32 to vector<48x128xf32>
    %28 = arith.mulf %27, %3 : vector<48x128xf32>
    %cst_6 = arith.constant 0.000000e+00 : f32
    %29 = vector.broadcast %cst_6 : f32 to vector<48x128xf32>
    %30 = arith.cmpf oge, %25, %29 : vector<48x128xf32>
    %31 = arith.mulf %26, %4 : vector<48x128xf32>
    %32 = arith.subf %3, %31 : vector<48x128xf32>
    %33 = arith.select %30, %3, %32 : vector<48x128xi1>, vector<48x128xf32>
    %cst_7 = arith.constant 8.000000e-01 : f32
    %34 = vector.broadcast %cst_7 : f32 to vector<48x128xf32>
    %35 = arith.mulf %34, %33 : vector<48x128xf32>
    %36 = arith.addf %28, %35 : vector<48x128xf32>
    %c0_8 = arith.constant 0 : index
    %c0_9 = arith.constant 0 : index
    %37 = vector.load %arg3[%c0_8, %c0_9] : memref<48x48xf32, #tpu.memory_space<vmem>>, vector<48x48xf32>
    %cst_10 = arith.constant dense<0.000000e+00> : vector<48x128xf32>
    %38 = tpu.matmul %37, %36, %cst_10 {dimension_numbers = #tpu.dot_dimension_numbers<[1], [0], [0], [1], [0, 0, 1, 1], [], []>} : vector<48x48xf32>, vector<48x128xf32>, vector<48x128xf32> -> vector<48x128xf32>
    %39 = vector.extract_strided_slice %38 {offsets = [0, 0], sizes = [24, 128], strides = [1, 1]} : vector<48x128xf32> to vector<24x128xf32>
    %40 = vector.extract_strided_slice %38 {offsets = [24, 0], sizes = [24, 128], strides = [1, 1]} : vector<48x128xf32> to vector<24x128xf32>
    %41 = arith.mulf %39, %40 : vector<24x128xf32>
    %42 = arith.mulf %40, %40 : vector<24x128xf32>
    %43 = vector.extract_strided_slice %41 {offsets = [0, 0], sizes = [8, 128], strides = [1, 1]} : vector<24x128xf32> to vector<8x128xf32>
    %44 = vector.extract_strided_slice %41 {offsets = [8, 0], sizes = [8, 128], strides = [1, 1]} : vector<24x128xf32> to vector<8x128xf32>
    %45 = arith.addf %43, %44 : vector<8x128xf32>
    %46 = vector.extract_strided_slice %41 {offsets = [16, 0], sizes = [8, 128], strides = [1, 1]} : vector<24x128xf32> to vector<8x128xf32>
    %47 = arith.addf %45, %46 : vector<8x128xf32>
    %48 = vector.extract_strided_slice %42 {offsets = [0, 0], sizes = [8, 128], strides = [1, 1]} : vector<24x128xf32> to vector<8x128xf32>
    %49 = vector.extract_strided_slice %42 {offsets = [8, 0], sizes = [8, 128], strides = [1, 1]} : vector<24x128xf32> to vector<8x128xf32>
    %50 = arith.addf %48, %49 : vector<8x128xf32>
    %51 = vector.extract_strided_slice %42 {offsets = [16, 0], sizes = [8, 128], strides = [1, 1]} : vector<24x128xf32> to vector<8x128xf32>
    %52 = arith.addf %50, %51 : vector<8x128xf32>
    %cst_11 = arith.constant 1.000000e-07 : f32
    %53 = vector.broadcast %cst_11 : f32 to vector<8x128xf32>
    %54 = arith.addf %52, %53 : vector<8x128xf32>
    %55 = tpu.reciprocal %54 {approx = true} : vector<8x128xf32> -> vector<8x128xf32>
    %56 = arith.mulf %54, %55 : vector<8x128xf32>
    %cst_12 = arith.constant 2.000000e+00 : f32
    %57 = vector.broadcast %cst_12 : f32 to vector<8x128xf32>
    %58 = arith.subf %57, %56 : vector<8x128xf32>
    %59 = arith.mulf %55, %58 : vector<8x128xf32>
    %60 = arith.mulf %47, %59 : vector<8x128xf32>
    %61 = tpu.concatenate %47, %47, %47 in 0 : vector<8x128xf32>, vector<8x128xf32>, vector<8x128xf32> -> vector<24x128xf32>
    %62 = tpu.concatenate %60, %60, %60 in 0 : vector<8x128xf32>, vector<8x128xf32>, vector<8x128xf32> -> vector<24x128xf32>
    %cst_13 = arith.constant 2.000000e-01 : f32
    %63 = vector.broadcast %cst_13 : f32 to vector<24x128xf32>
    %64 = arith.mulf %63, %39 : vector<24x128xf32>
    %cst_14 = arith.constant 0.000000e+00 : f32
    %65 = vector.broadcast %cst_14 : f32 to vector<24x128xf32>
    %66 = arith.cmpf oge, %61, %65 : vector<24x128xf32>
    %67 = arith.mulf %62, %40 : vector<24x128xf32>
    %68 = arith.subf %39, %67 : vector<24x128xf32>
    %69 = arith.select %66, %39, %68 : vector<24x128xi1>, vector<24x128xf32>
    %cst_15 = arith.constant 8.000000e-01 : f32
    %70 = vector.broadcast %cst_15 : f32 to vector<24x128xf32>
    %71 = arith.mulf %70, %69 : vector<24x128xf32>
    %72 = arith.addf %64, %71 : vector<24x128xf32>
    %c0_16 = arith.constant 0 : index
    %c0_17 = arith.constant 0 : index
    %73 = vector.load %arg4[%c0_16, %c0_17] : memref<9x24xf32, #tpu.memory_space<vmem>>, vector<9x24xf32>
    %cst_18 = arith.constant dense<0.000000e+00> : vector<9x128xf32>
    %74 = tpu.matmul %73, %72, %cst_18 {dimension_numbers = #tpu.dot_dimension_numbers<[1], [0], [0], [1], [0, 0, 1, 1], [], []>} : vector<9x24xf32>, vector<24x128xf32>, vector<9x128xf32> -> vector<9x128xf32>
    %c0_19 = arith.constant 0 : index
    %c0_20 = arith.constant 0 : index
    %75 = vector.load %arg6[%c0_19, %c0_20] : memref<9x128xf32, #tpu.memory_space<vmem>>, vector<9x128xf32>
    tpu.vector_store %arg6[%c0_19, %c0_20], %74 {strides = array<i32>} : memref<9x128xf32, #tpu.memory_space<vmem>>, vector<9x128xf32>,
    %76 = vector.extract_strided_slice %0 {offsets = [0, 0], sizes = [32, 128], strides = [1, 1]} : vector<96x128xf32> to vector<32x128xf32>
    %77 = vector.extract_strided_slice %0 {offsets = [32, 0], sizes = [32, 128], strides = [1, 1]} : vector<96x128xf32> to vector<32x128xf32>
    %78 = vector.extract_strided_slice %0 {offsets = [64, 0], sizes = [32, 128], strides = [1, 1]} : vector<96x128xf32> to vector<32x128xf32>
    %79 = vector.extract_strided_slice %74 {offsets = [0, 0], sizes = [1, 128], strides = [1, 1]} : vector<9x128xf32> to vector<1x128xf32>
    %80 = vector.broadcast %79 : vector<1x128xf32> to vector<32x128xf32>
    %81 = arith.mulf %76, %80 : vector<32x128xf32>
    %82 = vector.extract_strided_slice %74 {offsets = [3, 0], sizes = [1, 128], strides = [1, 1]} : vector<9x128xf32> to vector<1x128xf32>
    %83 = vector.broadcast %82 : vector<1x128xf32> to vector<32x128xf32>
    %84 = arith.mulf %77, %83 : vector<32x128xf32>
    %85 = arith.addf %81, %84 : vector<32x128xf32>
    %86 = vector.extract_strided_slice %74 {offsets = [6, 0], sizes = [1, 128], strides = [1, 1]} : vector<9x128xf32> to vector<1x128xf32>
    %87 = vector.broadcast %86 : vector<1x128xf32> to vector<32x128xf32>
    %88 = arith.mulf %78, %87 : vector<32x128xf32>
    %89 = arith.addf %85, %88 : vector<32x128xf32>
    %90 = vector.extract_strided_slice %74 {offsets = [1, 0], sizes = [1, 128], strides = [1, 1]} : vector<9x128xf32> to vector<1x128xf32>
    %91 = vector.broadcast %90 : vector<1x128xf32> to vector<32x128xf32>
    %92 = arith.mulf %76, %91 : vector<32x128xf32>
    %93 = vector.extract_strided_slice %74 {offsets = [4, 0], sizes = [1, 128], strides = [1, 1]} : vector<9x128xf32> to vector<1x128xf32>
    %94 = vector.broadcast %93 : vector<1x128xf32> to vector<32x128xf32>
    %95 = arith.mulf %77, %94 : vector<32x128xf32>
    %96 = arith.addf %92, %95 : vector<32x128xf32>
    %97 = vector.extract_strided_slice %74 {offsets = [7, 0], sizes = [1, 128], strides = [1, 1]} : vector<9x128xf32> to vector<1x128xf32>
    %98 = vector.broadcast %97 : vector<1x128xf32> to vector<32x128xf32>
    %99 = arith.mulf %78, %98 : vector<32x128xf32>
    %100 = arith.addf %96, %99 : vector<32x128xf32>
    %101 = vector.extract_strided_slice %74 {offsets = [2, 0], sizes = [1, 128], strides = [1, 1]} : vector<9x128xf32> to vector<1x128xf32>
    %102 = vector.broadcast %101 : vector<1x128xf32> to vector<32x128xf32>
    %103 = arith.mulf %76, %102 : vector<32x128xf32>
    %104 = vector.extract_strided_slice %74 {offsets = [5, 0], sizes = [1, 128], strides = [1, 1]} : vector<9x128xf32> to vector<1x128xf32>
    %105 = vector.broadcast %104 : vector<1x128xf32> to vector<32x128xf32>
    %106 = arith.mulf %77, %105 : vector<32x128xf32>
    %107 = arith.addf %103, %106 : vector<32x128xf32>
    %108 = vector.extract_strided_slice %74 {offsets = [8, 0], sizes = [1, 128], strides = [1, 1]} : vector<9x128xf32> to vector<1x128xf32>
    %109 = vector.broadcast %108 : vector<1x128xf32> to vector<32x128xf32>
    %110 = arith.mulf %78, %109 : vector<32x128xf32>
    %111 = arith.addf %107, %110 : vector<32x128xf32>
    %112 = tpu.concatenate %89, %100, %111 in 0 : vector<32x128xf32>, vector<32x128xf32>, vector<32x128xf32> -> vector<96x128xf32>
    %c0_21 = arith.constant 0 : index
    %c0_22 = arith.constant 0 : index
    %113 = vector.load %arg5[%c0_21, %c0_22] : memref<96x128xf32, #tpu.memory_space<vmem>>, vector<96x128xf32>
    tpu.vector_store %arg5[%c0_21, %c0_22], %112 {strides = array<i32>} : memref<96x128xf32, #tpu.memory_space<vmem>>, vector<96x128xf32>,
    return
  }
  func.func @transform_0(%arg0: i32) -> (i32, i32) {
    %c0_i32 = arith.constant 0 : i32
    %c0_i32_0 = arith.constant 0 : i32
    return %c0_i32, %arg0 : i32, i32
  }
  func.func @transform_1(%arg0: i32) -> (i32, i32) {
    %c0_i32 = arith.constant 0 : i32
    %c0_i32_0 = arith.constant 0 : i32
    %c0_i32_1 = arith.constant 0 : i32
    return %c0_i32, %c0_i32_0 : i32, i32
  }
  func.func @transform_2(%arg0: i32) -> (i32, i32) {
    %c0_i32 = arith.constant 0 : i32
    %c0_i32_0 = arith.constant 0 : i32
    %c0_i32_1 = arith.constant 0 : i32
    return %c0_i32, %c0_i32_0 : i32, i32
  }
  func.func @transform_3(%arg0: i32) -> (i32, i32) {
    %c0_i32 = arith.constant 0 : i32
    %c0_i32_0 = arith.constant 0 : i32
    %c0_i32_1 = arith.constant 0 : i32
    return %c0_i32, %c0_i32_0 : i32, i32
  }
  func.func @transform_4(%arg0: i32) -> (i32, i32) {
    %c0_i32 = arith.constant 0 : i32
    %c0_i32_0 = arith.constant 0 : i32
    return %c0_i32, %arg0 : i32, i32
  }
  func.func @transform_5(%arg0: i32) -> (i32, i32) {
    %c0_i32 = arith.constant 0 : i32
    %c0_i32_0 = arith.constant 0 : i32
    return %c0_i32, %arg0 : i32, i32
  }
}

</mosaic_0001>

<bundles_post_ra>
// kernel: tpu_custom_call.1
= control target key start
LH: loop header
LB: loop body
LE: loop exit
PB: predicated region body
PF: predicated region fallthrough
CT: control target
= control target key end

     0   :  { %11 = vsyncpa [#allocation3], 0  ;;  %s935_s0 = inlined_call_operand.hbm [shape: f32[96,128], index: 0, kind: input, shape index: {}]   ;;  %s936_s1 = inlined_call_operand.hbm [shape: f32[96,96], index: 1, kind: input, shape index: {}]   ;;  %s937_s2 = inlined_call_operand.hbm [shape: f32[48,48], index: 2, kind: input, shape index: {}]   ;;  %s938_s3 = inlined_call_operand.hbm [shape: f32[9,24], index: 3, kind: input, shape index: {}]   ;;  %s939_s4 = inlined_call_operand.hbm [shape: f32[96,128], index: 4, kind: output, shape index: {0}]   ;;  %s940_s5 = inlined_call_operand.hbm [shape: f32[9,128], index: 5, kind: output, shape index: {1}]  }
   0x1   :  { %12 = vsyncpa [#allocation6], 0 }
   0x2   :  { %13 = vsyncpa [#allocation9], 0 }
   0x3   :  { %14 = vsyncpa [#allocation4], 0 }
   0x4   :  { %15 = vsyncpa [#allocation12], 0  ;;  %s33_s20 = sshll.u32 %s936_s1, 4  ;;  %s729_s21 = smov [#allocation5]   ;;  %s34_s20 = int_to_ptr.hbm [resolvable:$true] %s33_s20 }
   0x5   :  { %s35_s22 = sshll.u32 %s729_s21, 4  ;;  %s20_s25 = sshll.u32 %s935_s0, 4  ;;  %s36_s22 = int_to_ptr.vmem [resolvable:$true] %s35_s22  ;;  %s21_s25 = int_to_ptr.hbm [resolvable:$true] %s20_s25 }
   0x6   :  { %s730_s26 = smov 128   ;;  %s731_s27 = smov 8  }
   0x7   :  { %41 = dma.hbm_to_vmem [thread:$0]  %s34_s20, 1536, %s36_s22, [#allocation6], %s730_s26, %s730_s26, %s731_s27  }
   0x8   :  { %s732_s28 = smov [#allocation2]   ;;  %s46_s1 = sshll.u32 %s937_s2, 4  ;;  %s47_s1 = int_to_ptr.hbm [resolvable:$true] %s46_s1 }
   0x9   :  { %s22_s29 = sshll.u32 %s732_s28, 4  ;;  %s59_s8 = sshll.u32 %s938_s3, 4  ;;  %s23_s29 = int_to_ptr.vmem [resolvable:$true] %s22_s29  ;;  %s60_s8 = int_to_ptr.hbm [resolvable:$true] %s59_s8 }
   0xa   :  { %28 = dma.hbm_to_vmem [thread:$0]  %s21_s25, 1536, %s23_s29, [#allocation3], %s730_s26, %s730_s26, %s731_s27  }
   0xb   :  { %s733_s9 = smov [#allocation7]   ;;  %s734_s11 = smov [#allocation8]  }
   0xc   :  { %s48_s10 = sshll.u32 %s733_s9, 4  ;;  %s61_s2 = sshll.u32 %s734_s11, 4  ;;  %s49_s10 = int_to_ptr.vmem [resolvable:$true] %s48_s10  ;;  %s62_s2 = int_to_ptr.vmem [resolvable:$true] %s61_s2 }
   0xd   :  { %54 = dma.hbm_to_vmem [thread:$0]  %s47_s1, 768, %s49_s10, [#allocation6], %s730_s26, %s730_s26, %s731_s27  }
   0xe   :  { %67 = dma.hbm_to_vmem [thread:$0]  %s60_s8, 256, %s62_s2, [#allocation9], %s730_s26, %s730_s26, %s731_s27  }
   0xf   :  { %719 = dma.done.wait [#allocation3], 1536  }
  0x10   :  { %720 = vsyncadd [#allocation3], 4294965760 }
  0x11   :  { %721 = dma.done.wait [#allocation6], 2304  }
  0x12   :  { %722 = vsyncadd [#allocation6], 4294964992 }
  0x13   :  { %723 = dma.done.wait [#allocation9], 256  }
  0x14   :  { %724 = vsyncadd [#allocation9], 4294967040  ;;  %v791_v0 = vld [vmem:[#allocation2 + $0x58] sm:$0xff]  ;;  %v793_v1 = vld [vmem:[#allocation2 + $0x50] sm:$0xff]  ;;  %vm108_vm0 = vcmask 785408   ;;  %vm274_vm3 = vcmask 392192  }
  0x15   :  { %149 = vmatpush.msra.mxu0 %v791_v0  ;;  %537 = vmatpush.msra.mxu2 %v791_v0  ;;  %v798_v2 = vld [vmem:[#allocation2 + $0x48] sm:$0xff]  ;;  %v803_v3 = vld [vmem:[#allocation2 + $0x40] sm:$0xff]  ;;  %v808_v4 = vld [vmem:[#allocation2 + $0x38] sm:$0xff]  ;;  %vm365_vm5 = vcmask 195584   ;;  %s735_s3 = smov [#allocation11]   ;;  %s497_s15 = sshll.u32 %s940_s5, 4  ;;  %s498_s15 = int_to_ptr.hbm [resolvable:$true] %s497_s15 }
  0x16   :  { %538 = vmatpush.msra.mxu3 %v791_v0  ;;  %v813_v5 = vld [vmem:[#allocation2 + $0x30] sm:$0xff]  ;;  %v818_v6 = vld [vmem:[#allocation2 + $0x28] sm:$0xff]  ;;  %v823_v7 = vld [vmem:[#allocation2 + $0x20] sm:$0xff]  ;;  %s892_s12 = sshll.u32 %s735_s3, 4  ;;  %s736_s5 = smov [#allocation10]   ;;  %s496_s12 = int_to_ptr.vmem [resolvable:$true] %s892_s12 }
  0x17   :  { %150 = vmatpush.msra.mxu0 %v793_v1  ;;  %539 = vmatpush.msra.mxu2 %v793_v1  ;;  %v828_v8 = vld [vmem:[#allocation2 + $0x18] sm:$0xff]  ;;  %v833_v9 = vld [vmem:[#allocation2 + $0x10] sm:$0xff]  ;;  %v838_v10 = vld [vmem:[#allocation2 + $0x8] sm:$0xff]  ;;  %s482_s16 = sshll.u32 %s736_s5, 4  ;;  %s484_s19 = sshll.u32 %s939_s4, 4  ;;  %s483_s16 = int_to_ptr.vmem [resolvable:$true] %s482_s16  ;;  %s485_s19 = int_to_ptr.hbm [resolvable:$true] %s484_s19 }
  0x18   :  { %540 = vmatpush.msra.mxu3 %v793_v1  ;;  %v843_v11 = vld [vmem:[#allocation2] sm:$0xff]  ;;  %v103_v14 = vld [vmem:[#allocation5 + $0x38] sm:$0xff]  ;;  %v97_v15 = vld [vmem:[#allocation5 + $0x8] sm:$0xff] }
  0x19   :  { %151 = vmatpush.msra.mxu0 %v798_v2  ;;  %541 = vmatpush.msra.mxu2 %v798_v2  ;;  %v96_v12 = vld [vmem:[#allocation5] sm:$0xff]  ;;  %v101_v16 = vld [vmem:[#allocation5 + $0x28] sm:$0xff]  ;;  %v98_v18 = vld [vmem:[#allocation5 + $0x10] sm:$0xff] }
  0x1a   :  { %542 = vmatpush.msra.mxu3 %v798_v2  ;;  %v100_v13 = vld [vmem:[#allocation5 + $0x20] sm:$0xff]  ;;  %v102_v19 = vld [vmem:[#allocation5 + $0x30] sm:$0xff]  ;;  %v105_v20 = vld [vmem:[#allocation5 + $0x48] sm:$0xff] }
  0x1b   :  { %152 = vmatpush.msra.mxu0 %v803_v3  ;;  %543 = vmatpush.msra.mxu2 %v803_v3  ;;  %v104_v17 = vld [vmem:[#allocation5 + $0x40] sm:$0xff]  ;;  %v99_v21 = vld [vmem:[#allocation5 + $0x18] sm:$0xff]  ;;  %v106_v22 = vld [vmem:[#allocation5 + $0x50] sm:$0xff] }
  0x1c   :  { %544 = vmatpush.msra.mxu3 %v803_v3  ;;  %v107_v23 = vld [vmem:[#allocation5 + $0x58] sm:$0xff] }
  0x1d   :  { %153 = vmatpush.msra.mxu0 %v808_v4  ;;  %545 = vmatpush.msra.mxu2 %v808_v4 }
  0x1e   :  { %546 = vmatpush.msra.mxu3 %v808_v4 }
  0x1f   :  { %154 = vmatpush.msra.mxu0 %v813_v5  ;;  %547 = vmatpush.msra.mxu2 %v813_v5 }
  0x20   :  { %548 = vmatpush.msra.mxu3 %v813_v5 }
  0x21   :  { %155 = vmatpush.msra.mxu0 %v818_v6  ;;  %549 = vmatpush.msra.mxu2 %v818_v6 }
  0x22   :  { %550 = vmatpush.msra.mxu3 %v818_v6 }
  0x23   :  { %156 = vmatpush.msra.mxu0 %v823_v7  ;;  %551 = vmatpush.msra.mxu2 %v823_v7 }
  0x24   :  { %552 = vmatpush.msra.mxu3 %v823_v7 }
  0x25   :  { %157 = vmatpush.msra.mxu0 %v828_v8  ;;  %553 = vmatpush.msra.mxu2 %v828_v8 }
  0x26   :  { %554 = vmatpush.msra.mxu3 %v828_v8 }
  0x27   :  { %158 = vmatpush.msra.mxu0 %v833_v9  ;;  %555 = vmatpush.msra.mxu2 %v833_v9 }
  0x28   :  { %556 = vmatpush.msra.mxu3 %v833_v9 }
  0x29   :  { %159 = vmatpush.msra.mxu0 %v838_v10  ;;  %557 = vmatpush.msra.mxu2 %v838_v10 }
  0x2a   :  { %558 = vmatpush.msra.mxu3 %v838_v10 }
  0x2b   :  { %160 = vmatpush.msra.mxu0 %v843_v11  ;;  %559 = vmatpush.msra.mxu2 %v843_v11 }
  0x2c   :  { %560 = vmatpush.msra.mxu3 %v843_v11  ;;  %517 = vmatmul.msk.f32.vlgmr.msra.gmra.mxu0 %vm108_vm0, %v96_v12 }
  0x2d   :  { %521 = vmatmul.msk.f32.vlgmr.msra.gmra.mxu2 %vm108_vm0, %v100_v13  ;;  %524 = vmatmul.msk.f32.vlgmr.msra.gmra.mxu3 %vm108_vm0, %v103_v14 }
  0x34   :  { %518 = vmatmul.msk.f32.gmra.mxu0 %vm108_vm0, %v97_v15 }
  0x35   :  { %522 = vmatmul.msk.f32.gmra.mxu2 %vm108_vm0, %v101_v16  ;;  %525 = vmatmul.msk.f32.gmra.mxu3 %vm108_vm0, %v104_v17 }
  0x3c   :  { %519 = vmatmul.msk.f32.gmra.mxu0 %vm108_vm0, %v98_v18 }
  0x3d   :  { %523 = vmatmul.msk.f32.gmra.mxu2 %vm108_vm0, %v102_v19  ;;  %526 = vmatmul.msk.f32.gmra.mxu3 %vm108_vm0, %v105_v20 }
  0x44   :  { %520 = vmatmul.msk.f32.gmra.mxu0 %vm108_vm0, %v99_v21 }
  0x45   :  { %527 = vmatmul.msk.f32.gmra.mxu3 %vm108_vm0, %v106_v22 }
  0x4d   :  { %528 = vmatmul.msk.f32.gmra.mxu3 %vm108_vm0, %v107_v23 }
  0xa9   :  { %v865_v28 = vpop.f32.mrf.mxu0 }
  0xb0   :  { %v863_v24 = vpop.f32.mrf.mxu2  ;;  %v183_v25 = vpop.f32.mrf.mxu3 }
  0xb1   :  { %v867_v31 = vpop.f32.mrf.mxu0  ;;  %v205_v40 = vmul.f32 %v183_v25, %v183_v25 }
  0xb2   :  { %v199_v60 = vmul.f32 %v183_v25, %v867_v31 }
  0xb8   :  { %v177_v26 = vpop.f32.mrf.mxu2  ;;  %v186_v27 = vpop.f32.mrf.mxu3 }
  0xb9   :  { %v206_v33 = vmul.f32 %v186_v27, %v186_v27  ;;  %v168_v41 = vpop.f32.mrf.mxu0 }
  0xba   :  { %v200_v49 = vmul.f32 %v186_v27, %v168_v41 }
  0xc0   :  { %v189_v29 = vpop.f32.mrf.mxu3  ;;  %v180_v30 = vpop.f32.mrf.mxu2 }
  0xc1   :  { %v204_v32 = vmul.f32 %v180_v30, %v180_v30  ;;  %v207_v38 = vmul.f32 %v189_v29, %v189_v29  ;;  %v198_v46 = vmul.f32 %v180_v30, %v865_v28  ;;  %v171_v54 = vpop.f32.mrf.mxu0 }
  0xc2   :  { %v201_v57 = vmul.f32 %v189_v29, %v171_v54 }
  0xc3   :  { %v214_v35 = vadd.f32 %v206_v33, %v204_v32  ;;  %v215_v43 = vadd.f32 %v207_v38, %v205_v40  ;;  %v210_v52 = vadd.f32 %v200_v49, %v198_v46  ;;  %v235_v38 = vmul.f32 0.2, %v177_v26 }
  0xc4   :  { %v211_v63 = vadd.f32 %v201_v57, %v199_v60  ;;  %v270_v57 = vld [vmem:[#allocation7 + $0x10] sm:$0xff] }
  0xc8   :  { %v192_v34 = vpop.f32.mrf.mxu3 }
  0xc9   :  { %v208_v36 = vmul.f32 %v192_v34, %v192_v34  ;;  %v202_v50 = vmul.f32 %v192_v34, %v863_v24 }
  0xcb   :  { %v216_v37 = vadd.f32 %v214_v35, %v208_v36  ;;  %v212_v55 = vadd.f32 %v210_v52, %v202_v50 }
  0xcd   :  { %v218_v39 = vadd.f32 1e-07, %v216_v37  ;;  %vm236_vm1 = vcmp.ge.f32.partialorder %v212_v55, 0.0 }
  0xcf   :  { %569 = vrcp.f32 %v218_v39 }
  0xd0   :  { %v195_v42 = vpop.f32.mrf.mxu3 }
  0xd1   :  { %v209_v44 = vmul.f32 %v195_v42, %v195_v42  ;;  %v203_v61 = vmul.f32 %v195_v42, %v177_v26 }
  0xd3   :  { %v217_v45 = vadd.f32 %v215_v43, %v209_v44  ;;  %v213_v14 = vadd.f32 %v211_v63, %v203_v61 }
  0xd5   :  { %v570_v47 = vpop.eup %569  ;;  %v219_v48 = vadd.f32 1e-07, %v217_v45  ;;  %vm237_vm2 = vcmp.ge.f32.partialorder %v213_v14, 0.0  ;;  %v233_v45 = vmul.f32 0.2, %v171_v54 }
  0xd6   :  { %v222_v51 = vmul.f32 %v570_v47, %v218_v39 }
  0xd7   :  { %571 = vrcp.f32 %v219_v48 }
  0xd8   :  { %v224_v53 = vsub.f32 2.0, %v222_v51  ;;  %v231_v51 = vmul.f32 0.2, %v867_v31 }
  0xda   :  { %v226_v56 = vmul.f32 %v570_v47, %v224_v53  ;;  %v230_v53 = vmul.f32 0.2, %v865_v28 }
  0xdc   :  { %v228_v58 = vmul.f32 %v226_v56, %v212_v55  ;;  %v269_v55 = vld [vmem:[#allocation7 + $0x8] sm:$0xff] }
  0xdd   :  { %v572_v59 = vpop.eup %571 }
  0xde   :  { %v223_v62 = vmul.f32 %v572_v59, %v219_v48  ;;  %v242_v12 = vmul.f32 %v228_v58, %v192_v34  ;;  %v240_v18 = vmul.f32 %v228_v58, %v186_v27  ;;  %v238_v22 = vmul.f32 %v228_v58, %v180_v30  ;;  %v272_v58 = vld [vmem:[#allocation7 + $0x20] sm:$0xff] }
  0xdf   :  { %v234_v30 = vmul.f32 0.2, %v863_v24  ;;  %v232_v48 = vmul.f32 0.2, %v168_v41 }
  0xe0   :  { %v225_v13 = vsub.f32 2.0, %v223_v62  ;;  %v248_v16 = vsub.f32 %v863_v24, %v242_v12  ;;  %v246_v35 = vsub.f32 %v168_v41, %v240_v18 }
  0xe2   :  { %v227_v15 = vmul.f32 %v572_v59, %v225_v13  ;;  %v254_v32 = vsel %vm236_vm1, %v863_v24, %v248_v16  ;;  %v252_v27 = vsel %vm236_vm1, %v168_v41, %v246_v35  ;;  %v271_v41 = vld [vmem:[#allocation7 + $0x18] sm:$0xff] }
  0xe3   :  { %v260_v40 = vmul.f32 0.8, %v254_v32  ;;  %v258_v46 = vmul.f32 0.8, %v252_v27 }
  0xe4   :  { %v229_v17 = vmul.f32 %v227_v15, %v213_v14 }
  0xe5   :  { %v266_v44 = vadd.f32 %v260_v40, %v234_v30  ;;  %v264_v50 = vadd.f32 %v258_v46, %v232_v48 }
  0xe6   :  { %v243_v19 = vmul.f32 %v229_v17, %v195_v42  ;;  %v241_v20 = vmul.f32 %v229_v17, %v189_v29  ;;  %v239_v21 = vmul.f32 %v229_v17, %v183_v25  ;;  %v244_v25 = vsub.f32 %v865_v28, %v238_v22 }
  0xe8   :  { %v249_v23 = vsub.f32 %v177_v26, %v243_v19  ;;  %v247_v33 = vsub.f32 %v171_v54, %v241_v20  ;;  %v245_v37 = vsub.f32 %v867_v31, %v239_v21  ;;  %v250_v47 = vsel %vm236_vm1, %v865_v28, %v244_v25 }
  0xe9   :  { %v256_v52 = vmul.f32 0.8, %v250_v47 }
  0xea   :  { %v255_v34 = vsel %vm237_vm2, %v177_v26, %v249_v23  ;;  %v253_v36 = vsel %vm237_vm2, %v171_v54, %v247_v33  ;;  %v251_v43 = vsel %vm237_vm2, %v867_v31, %v245_v37  ;;  %v268_v54 = vld [vmem:[#allocation7] sm:$0xff]  ;;  %v273_v31 = vld [vmem:[#allocation7 + $0x28] sm:$0xff] }
  0xeb   :  { %v261_v39 = vmul.f32 0.8, %v255_v34  ;;  %v259_v42 = vmul.f32 0.8, %v253_v36  ;;  %v257_v49 = vmul.f32 0.8, %v251_v43  ;;  %v262_v56 = vadd.f32 %v256_v52, %v230_v53 }
  0xed   :  { %v267_v29 = vadd.f32 %v261_v39, %v235_v38  ;;  %v265_v26 = vadd.f32 %v259_v42, %v233_v45  ;;  %v263_v24 = vadd.f32 %v257_v49, %v231_v51  ;;  %v364_v51 = vld [vmem:[#allocation8 + $0x8] sm:$0x1] }
  0xef   :  { %303 = vmatpush.msra.mxu1 %v267_v29 }
  0xf1   :  { %304 = vmatpush.msra.mxu1 %v266_v44 }
  0xf3   :  { %305 = vmatpush.msra.mxu1 %v265_v26 }
  0xf5   :  { %306 = vmatpush.msra.mxu1 %v264_v50  ;;  %v363_v50 = vld [vmem:[#allocation8] sm:$0xff] }
  0xf7   :  { %307 = vmatpush.msra.mxu1 %v263_v24 }
  0xf9   :  { %308 = vmatpush.msra.mxu1 %v262_v56 }
  0xfa   :  { %529 = vmatmul.msk.f32.vlgmr.msra.gmra.mxu1 %vm274_vm3, %v268_v54 }
 0x102   :  { %530 = vmatmul.msk.f32.gmra.mxu1 %vm274_vm3, %v269_v55 }
 0x10a   :  { %531 = vmatmul.msk.f32.gmra.mxu1 %vm274_vm3, %v270_v57 }
 0x112   :  { %532 = vmatmul.msk.f32.gmra.mxu1 %vm274_vm3, %v271_v41 }
 0x11a   :  { %533 = vmatmul.msk.f32.gmra.mxu1 %vm274_vm3, %v272_v58 }
 0x122   :  { %534 = vmatmul.msk.f32.gmra.mxu1 %vm274_vm3, %v273_v31 }
 0x177   :  { %v310_v59 = vpop.f32.mrf.mxu1 }
 0x178   :  { %v344_v48 = vmul.f32 0.2, %v310_v59 }
 0x17f   :  { %v313_v60 = vpop.f32.mrf.mxu1 }
 0x180   :  { %v345_v46 = vmul.f32 0.2, %v313_v60 }
 0x187   :  { %v316_v61 = vpop.f32.mrf.mxu1 }
 0x188   :  { %v346_v42 = vmul.f32 0.2, %v316_v61 }
 0x18f   :  { %v319_v28 = vpop.f32.mrf.mxu1 }
 0x190   :  { %v331_v12 = vmul.f32 %v319_v28, %v319_v28  ;;  %v328_v20 = vmul.f32 %v319_v28, %v310_v59 }
 0x197   :  { %v322_v62 = vpop.f32.mrf.mxu1 }
 0x198   :  { %v332_v63 = vmul.f32 %v322_v62, %v322_v62  ;;  %v329_v18 = vmul.f32 %v322_v62, %v313_v60 }
 0x19a   :  { %v336_v14 = vadd.f32 %v332_v63, %v331_v12  ;;  %v334_v23 = vadd.f32 %v329_v18, %v328_v20 }
 0x19f   :  { %v325_v13 = vpop.f32.mrf.mxu1 }
 0x1a0   :  { %v333_v15 = vmul.f32 %v325_v13, %v325_v13  ;;  %v330_v21 = vmul.f32 %v325_v13, %v316_v61 }
 0x1a2   :  { %v337_v16 = vadd.f32 %v336_v14, %v333_v15  ;;  %v335_v33 = vadd.f32 %v334_v23, %v330_v21 }
 0x1a4   :  { %v338_v17 = vadd.f32 1e-07, %v337_v16  ;;  %vm347_vm4 = vcmp.ge.f32.partialorder %v335_v33, 0.0 }
 0x1a6   :  { %573 = vrcp.f32 %v338_v17 }
 0x1ac   :  { %v574_v19 = vpop.eup %573 }
 0x1ad   :  { %v340_v22 = vmul.f32 %v574_v19, %v338_v17 }
 0x1af   :  { %v341_v32 = vsub.f32 2.0, %v340_v22 }
 0x1b1   :  { %v342_v35 = vmul.f32 %v574_v19, %v341_v32 }
 0x1b3   :  { %v343_v34 = vmul.f32 %v342_v35, %v335_v33 }
 0x1b5   :  { %v350_v36 = vmul.f32 %v343_v34, %v325_v13  ;;  %v349_v37 = vmul.f32 %v343_v34, %v322_v62  ;;  %v348_v38 = vmul.f32 %v343_v34, %v319_v28 }
 0x1b7   :  { %v353_v39 = vsub.f32 %v316_v61, %v350_v36  ;;  %v352_v40 = vsub.f32 %v313_v60, %v349_v37  ;;  %v351_v27 = vsub.f32 %v310_v59, %v348_v38 }
 0x1b9   :  { %v356_v25 = vsel %vm347_vm4, %v316_v61, %v353_v39  ;;  %v355_v29 = vsel %vm347_vm4, %v313_v60, %v352_v40  ;;  %v354_v30 = vsel %vm347_vm4, %v310_v59, %v351_v27 }
 0x1ba   :  { %v359_v43 = vmul.f32 0.8, %v356_v25  ;;  %v358_v44 = vmul.f32 0.8, %v355_v29  ;;  %v357_v47 = vmul.f32 0.8, %v354_v30 }
 0x1bc   :  { %v362_v45 = vadd.f32 %v359_v43, %v346_v42  ;;  %v361_v26 = vadd.f32 %v358_v44, %v345_v46  ;;  %v360_v49 = vadd.f32 %v357_v47, %v344_v48 }
 0x1be   :  { %385 = vmatpush.msrb.mxu2 %v362_v45 }
 0x1c0   :  { %386 = vmatpush.msrb.mxu2 %v361_v26 }
 0x1c2   :  { %387 = vmatpush.msrb.mxu2 %v360_v49 }
 0x1c3   :  { %535 = vmatmul.msk.f32.vlgmr.msrb.gmra.mxu2 %vm365_vm5, %v363_v50 }
 0x1cb   :  { %536 = vmatmul.msk.f32.gmra.mxu2 %vm365_vm5, %v364_v51 }
 0x246   :  { %v389_v52 = vpop.f32.mrf.mxu2 }
 0x247   :  { %v397_v24 = vperm.slane %v389_v52, 0  ;;  %v402_v53 = vperm.slane %v389_v52, 3  ;;  %v411_v56 = vperm.slane %v389_v52, 6  ;;  %v420_v54 = vperm.slane %v389_v52, 1  ;;  %395 = vst [vmem:[#allocation11] sm:$0xff] %v389_v52 }
 0x248   :  { %v425_v55 = vperm.slane %v389_v52, 4  ;;  %v434_v57 = vperm.slane %v389_v52, 7  ;;  %v443_v41 = vperm.slane %v389_v52, 2  ;;  %v448_v58 = vperm.slane %v389_v52, 5 }
 0x249   :  { %v398_v31 = vmul.f32 %v397_v24, %v843_v11  ;;  %v399_v59 = vmul.f32 %v397_v24, %v838_v10  ;;  %v400_v60 = vmul.f32 %v397_v24, %v833_v9  ;;  %v401_v61 = vmul.f32 %v397_v24, %v828_v8 }
 0x24a   :  { %v403_v28 = vmul.f32 %v402_v53, %v823_v7  ;;  %v404_v62 = vmul.f32 %v402_v53, %v818_v6  ;;  %v405_v63 = vmul.f32 %v402_v53, %v813_v5  ;;  %v406_v12 = vmul.f32 %v402_v53, %v808_v4 }
 0x24b   :  { %v412_v13 = vmul.f32 %v411_v56, %v803_v3  ;;  %v413_v14 = vmul.f32 %v411_v56, %v798_v2  ;;  %v414_v15 = vmul.f32 %v411_v56, %v793_v1  ;;  %v415_v16 = vmul.f32 %v411_v56, %v791_v0 }
 0x24c   :  { %v407_v17 = vadd.f32 %v403_v28, %v398_v31  ;;  %v408_v18 = vadd.f32 %v404_v62, %v399_v59  ;;  %v409_v19 = vadd.f32 %v405_v63, %v400_v60  ;;  %v410_v20 = vadd.f32 %v406_v12, %v401_v61 }
 0x24d   :  { %v421_v21 = vmul.f32 %v420_v54, %v843_v11  ;;  %v422_v22 = vmul.f32 %v420_v54, %v838_v10  ;;  %v423_v23 = vmul.f32 %v420_v54, %v833_v9  ;;  %v424_v32 = vmul.f32 %v420_v54, %v828_v8 }
 0x24e   :  { %v416_v33 = vadd.f32 %v412_v13, %v407_v17  ;;  %v417_v35 = vadd.f32 %v413_v14, %v408_v18  ;;  %v418_v34 = vadd.f32 %v414_v15, %v409_v19  ;;  %v419_v36 = vadd.f32 %v415_v16, %v410_v20  ;;  %v392_v37 = vpop.f32.mrf.mxu2 }
 0x24f   :  { %v426_v38 = vmul.f32 %v425_v55, %v823_v7  ;;  %v427_v39 = vmul.f32 %v425_v55, %v818_v6  ;;  %v428_v40 = vmul.f32 %v425_v55, %v813_v5  ;;  %v429_v27 = vmul.f32 %v425_v55, %v808_v4  ;;  %396 = vst [vmem:[#allocation11 + $0x8] sm:$0x1] %v392_v37 }
 0x250   :  { %v435_v25 = vmul.f32 %v434_v57, %v803_v3  ;;  %v436_v29 = vmul.f32 %v434_v57, %v798_v2  ;;  %v437_v30 = vmul.f32 %v434_v57, %v793_v1  ;;  %v438_v42 = vmul.f32 %v434_v57, %v791_v0  ;;  %466 = vst [vmem:[#allocation10] sm:$0xff] %v416_v33  ;;  %503 = dma.vmem_to_hbm [thread:$0]  %s496_s12, 256, %s498_s15, [#allocation12], %s730_s26, %s730_s26, %s731_s27  }
 0x251   :  { %v430_v43 = vadd.f32 %v426_v38, %v421_v21  ;;  %v431_v44 = vadd.f32 %v427_v39, %v422_v22  ;;  %v432_v45 = vadd.f32 %v428_v40, %v423_v23  ;;  %v433_v46 = vadd.f32 %v429_v27, %v424_v32  ;;  %467 = vst [vmem:[#allocation10 + $0x8] sm:$0xff] %v417_v35 }
 0x252   :  { %468 = vst [vmem:[#allocation10 + $0x10] sm:$0xff] %v418_v34  ;;  %v444_v47 = vmul.f32 %v443_v41, %v843_v11  ;;  %v445_v26 = vmul.f32 %v443_v41, %v838_v10  ;;  %v446_v48 = vmul.f32 %v443_v41, %v833_v9  ;;  %v447_v49 = vmul.f32 %v443_v41, %v828_v8 }
 0x253   :  { %v439_v50 = vadd.f32 %v435_v25, %v430_v43  ;;  %v440_v51 = vadd.f32 %v436_v29, %v431_v44  ;;  %v441_v52 = vadd.f32 %v437_v30, %v432_v45  ;;  %v442_v24 = vadd.f32 %v438_v42, %v433_v46  ;;  %469 = vst [vmem:[#allocation10 + $0x18] sm:$0xff] %v419_v36 }
 0x254   :  { %v449_v53 = vmul.f32 %v448_v58, %v823_v7  ;;  %v450_v56 = vmul.f32 %v448_v58, %v818_v6  ;;  %v451_v54 = vmul.f32 %v448_v58, %v813_v5  ;;  %v452_v55 = vmul.f32 %v448_v58, %v808_v4 }
 0x255   :  { %470 = vst [vmem:[#allocation10 + $0x20] sm:$0xff] %v439_v50  ;;  %v457_v11 = vperm.slane %v392_v37, 0 }
 0x256   :  { %471 = vst [vmem:[#allocation10 + $0x28] sm:$0xff] %v440_v51  ;;  %v453_v10 = vadd.f32 %v449_v53, %v444_v47  ;;  %v454_v9 = vadd.f32 %v450_v56, %v445_v26  ;;  %v455_v57 = vadd.f32 %v451_v54, %v446_v48  ;;  %v456_v6 = vadd.f32 %v452_v55, %v447_v49 }
 0x257   :  { %472 = vst [vmem:[#allocation10 + $0x30] sm:$0xff] %v441_v52  ;;  %v458_v8 = vmul.f32 %v457_v11, %v803_v3  ;;  %v459_v41 = vmul.f32 %v457_v11, %v798_v2  ;;  %v460_v31 = vmul.f32 %v457_v11, %v793_v1  ;;  %v461_v7 = vmul.f32 %v457_v11, %v791_v0 }
 0x258   :  { %473 = vst [vmem:[#allocation10 + $0x38] sm:$0xff] %v442_v24 }
 0x259   :  { %v462_v5 = vadd.f32 %v458_v8, %v453_v10  ;;  %v463_v59 = vadd.f32 %v459_v41, %v454_v9  ;;  %v464_v4 = vadd.f32 %v460_v31, %v455_v57  ;;  %v465_v58 = vadd.f32 %v461_v7, %v456_v6 }
 0x25b   :  { %474 = vst [vmem:[#allocation10 + $0x40] sm:$0xff] %v462_v5 }
 0x25c   :  { %475 = vst [vmem:[#allocation10 + $0x48] sm:$0xff] %v463_v59 }
 0x25d   :  { %476 = vst [vmem:[#allocation10 + $0x50] sm:$0xff] %v464_v4 }
 0x25e   :  { %477 = vst [vmem:[#allocation10 + $0x58] sm:$0xff] %v465_v58 }
 0x25f   :  { %490 = dma.vmem_to_hbm [thread:$0]  %s483_s16, 1536, %s485_s19, [#allocation4], %s730_s26, %s730_s26, %s731_s27  }
 0x260   :  { %725 = dma.done.wait [#allocation4], 1536  }
 0x261   :  { %726 = vsyncadd [#allocation4], 4294965760 }
 0x262   :  { %727 = dma.done.wait [#allocation12], 256  }
 0x263   :  { %728 = vsyncadd [#allocation12], 4294967040 }
 0x264   :  { %512 = vsyncpa [#allocation3], 1 }
 0x265   :  { %513 = vsyncpa [#allocation6], 1 }
 0x266   :  { %514 = vsyncpa [#allocation9], 1 }
 0x267   :  { %515 = vsyncpa [#allocation4], 1 }
 0x268   :  { %516 = vsyncpa [#allocation12], 1 }

</bundles_post_ra>
